<compile_context>
chip_gen: v6e
topology: v6e:2x2x1
jax: 0.10.0
libtpu: 0.0.40
codegen_flags: <defaults>
</compile_context>

<pallas_src>
import jax
import jax.numpy as jnp
from jax import lax
from jax.experimental import pallas as pl
from jax.experimental.pallas import tpu as pltpu


def _round_up(x: int, m: int) -> int:
    return ((x + m - 1) // m) * m


def _make_lstm_kernel(ts: int, bt: int, hidden: int, unroll: int):
    H = hidden

    def lstm_kernel(x_ref, wih_ref, whh_ref, b_ref, out_ref, h_ref, c_ref,
                    xg_ref):
        """One (batch-tile, time-chunk) block of the LSTM recurrence.

        x_ref  : (ts, bt, D)   bf16  time-major input chunk
        wih_ref: (D, 4H)       bf16  input weights^T, gate order (i, f, o, g)
        whh_ref: (H, 4H)       bf16  recurrent weights^T, gate order (i, f, o, g)
        b_ref  : (1, 4H)       f32   b_ih + b_hh, gate order (i, f, o, g)
        out_ref: (ts, bt, H)   bf16  raw hidden states (mask applied in wrapper)
        h_ref  : (bt, H)       bf16  persistent scratch: hidden carry
        c_ref  : (bt, H)       f32   persistent scratch: cell carry
        xg_ref : (ts, bt, 4H)  f32   scratch: per-chunk input projection
        """
        D = x_ref.shape[-1]

        # New batch tile (time index 0) -> reset the recurrent state.
        @pl.when(pl.program_id(1) == 0)
        def _init():
            h_ref[...] = jnp.zeros_like(h_ref)
            c_ref[...] = jnp.zeros_like(c_ref)

        # Input projection for the whole chunk in one MXU pass (bf16 in, f32
        # acc).  (ts, bt, D) -> (ts*bt, D) is a free relabel since bt % 8 == 0.
        xg = jnp.dot(x_ref[...].reshape(ts * bt, D), wih_ref[...],
                     preferred_element_type=jnp.float32) + b_ref[...]
        xg_ref[...] = xg.reshape(ts, bt, 4 * H)

        whh = whh_ref[...]  # (H, 4H) bf16, resident in vregs across the loop

        def step(j, carry):
            h, c = carry  # h: (bt, H) bf16, c: (bt, H) f32
            # TODO(synk): for H >= 128 hold whh in MXU weight registers across
            # the chunk instead of re-pushing it every step.
            gates = xg_ref[j] + jnp.dot(h, whh,
                                        preferred_element_type=jnp.float32)
            # Gate order (i, f, o, g): one sigmoid over 3H lanes, one tanh over
            # the last H lanes.
            ifo = jax.nn.sigmoid(gates[:, :3 * H])
            g = jnp.tanh(gates[:, 3 * H:])
            i = ifo[:, 0:H]
            f = ifo[:, H:2 * H]
            o = ifo[:, 2 * H:3 * H]
            c = f * c + i * g                              # cell stays f32
            h = (o * jnp.tanh(c)).astype(jnp.bfloat16)     # bf16 feedback
            out_ref[j] = h
            return h, c

        h_fin, c_fin = lax.fori_loop(0, ts, step, (h_ref[...], c_ref[...]),
                                     unroll=unroll)
        h_ref[...] = h_fin
        c_ref[...] = c_fin

    return lstm_kernel


def rnn_forward(x, masks, params, *, time_chunk=32, batch_tile=8):
    """x: [B, S, D] f32; masks: [B, S] 0/1 prefix mask. Returns [B, S, H] f32."""
    B, S, D = x.shape
    H = params["w_hh"].shape[1]

    bt = max(8, _round_up(batch_tile, 8))        # sublane-aligned batch tile
    Bp = _round_up(max(B, bt), bt)
    n_b = Bp // bt

    # Per-generation VMEM budget: v5e/v6e = 128 MiB physical, v7x = 64 MiB.
    try:
        vmem_cap = pltpu.get_tpu_info().vmem_capacity_bytes
    except Exception:  # conservative fallback if the query is unavailable
        vmem_cap = 64 * 1024 * 1024
    vmem_limit = max(min(int(0.75 * vmem_cap), 112 * 1024 * 1024),
                     32 * 1024 * 1024)

    # Time-chunk: big chunks amortize the ~0.35us/grid-step overhead and grow
    # the input-projection GEMM M dim (ts*bt). Pad S up to a multiple of ts
    # (never shrink ts for awkward S); shrink ts only on VMEM pressure.
    ts = max(1, min(time_chunk, S))

    def _chunk_bytes(t):
        x_chunk = t * bt * D * 2               # bf16, double-buffered
        out_chunk = t * bt * H * 2             # bf16, double-buffered
        xg_scratch = t * bt * 4 * H * 4        # f32 scratch
        weights = ((D + H) * 4 * H) * 2 + 4 * H * 4
        carries = bt * H * (2 + 4)
        return 2 * (x_chunk + out_chunk) + 2 * weights + xg_scratch + carries

    while ts > 8 and _chunk_bytes(ts) > vmem_limit // 2:
        ts //= 2
    S_pad = _round_up(S, ts)
    n_t = S_pad // ts

    # Wrapper-side layout plumbing (single fused pad + transpose + cast copy):
    # time-major (S_pad, Bp, D) so each grid block is a rectangular tile and
    # the per-step access in-kernel is a leading-dim index.
    x_p = jnp.pad(x, ((0, Bp - B), (0, S_pad - S), (0, 0)))
    x_tm = jnp.transpose(x_p, (1, 0, 2)).astype(jnp.bfloat16)   # (S_pad, Bp, D)

    # PyTorch gate order is (i, f, g, o); reorder to (i, f, o, g).
    perm = jnp.concatenate([
        jnp.arange(0, H), jnp.arange(H, 2 * H),
        jnp.arange(3 * H, 4 * H), jnp.arange(2 * H, 3 * H)])
    wih_t = params["w_ih"][perm].T.astype(jnp.bfloat16)                 # (D, 4H)
    whh_t = params["w_hh"][perm].T.astype(jnp.bfloat16)                 # (H, 4H)
    bias = (params["b_ih"] + params["b_hh"])[perm].astype(jnp.float32)[None, :]

    unroll = int(min(ts, 8))   # bounded unroll: LLO visibility, no vreg spill

    grid_spec = pltpu.PrefetchScalarGridSpec(
        num_scalar_prefetch=0,
        grid=(n_b, n_t),
        in_specs=[
            pl.BlockSpec((ts, bt, D), lambda b_, t: (t, b_, 0)),   # x chunk
            pl.BlockSpec((D, 4 * H), lambda b_, t: (0, 0)),        # w_ih^T
            pl.BlockSpec((H, 4 * H), lambda b_, t: (0, 0)),        # w_hh^T
            pl.BlockSpec((1, 4 * H), lambda b_, t: (0, 0)),        # bias
        ],
        out_specs=pl.BlockSpec((ts, bt, H), lambda b_, t: (t, b_, 0)),
        scratch_shapes=[
            pltpu.VMEM((bt, H), jnp.bfloat16),          # hidden carry
            pltpu.VMEM((bt, H), jnp.float32),           # cell carry
            pltpu.VMEM((ts, bt, 4 * H), jnp.float32),   # chunk input projection
        ],
    )

    out_tm = pl.pallas_call(
        _make_lstm_kernel(ts, bt, H, unroll),
        out_shape=jax.ShapeDtypeStruct((S_pad, Bp, H), jnp.bfloat16),
        grid_spec=grid_spec,
        compiler_params=pltpu.CompilerParams(
            # Batch tiles are independent -> "parallel" (v7x 2-TC sharding);
            # the time axis carries the recurrence -> "arbitrary" (innermost).
            dimension_semantics=("parallel", "arbitrary"),
            vmem_limit_bytes=vmem_limit,
        ),
    )(x_tm, wih_t, whh_t, bias)

    out = jnp.transpose(out_tm, (1, 0, 2))[:B, :S].astype(jnp.float32)
    # rnn_out = rnn_out * masks.unsqueeze(-1); dropout is identity at inference.
    # TODO(synk): bidirectional / multi-layer variants and training-mode
    # dropout are not implemented (module config: 1-layer unidirectional LSTM).
    return out * masks[:, :, None].astype(jnp.float32)


def rnn_reference(x, masks, params):
    """Pure-JAX f32 reference (lax.scan LSTM), PyTorch gate order i,f,g,o."""
    B, S, D = x.shape
    H = params["w_hh"].shape[1]
    wih, whh = params["w_ih"], params["w_hh"]
    b = params["b_ih"] + params["b_hh"]

    def cell(carry, xt):
        h, c = carry
        gates = xt @ wih.T + h @ whh.T + b
        i, f, g, o = jnp.split(gates, 4, axis=-1)
        i, f, o = jax.nn.sigmoid(i), jax.nn.sigmoid(f), jax.nn.sigmoid(o)
        g = jnp.tanh(g)
        c = f * c + i * g
        h = o * jnp.tanh(c)
        return (h, c), h

    h0 = jnp.zeros((B, H), jnp.float32)
    c0 = jnp.zeros((B, H), jnp.float32)
    _, hs = lax.scan(cell, (h0, c0), jnp.transpose(x, (1, 0, 2)))
    return jnp.transpose(hs, (1, 0, 2)) * masks[:, :, None]


if __name__ == "__main__":
    B, S, D, H = 2, 8, 16, 32   # batch, sentence_num, input_dim, hidden_dim

    key = jax.random.PRNGKey(0)
    k_x, k_wih, k_whh, k_bih, k_bhh = jax.random.split(key, 5)

    bound = 1.0 / jnp.sqrt(H)   # PyTorch LSTM default init range
    params = {
        "w_ih": jax.random.uniform(k_wih, (4 * H, D), jnp.float32, -bound, bound),
        "w_hh": jax.random.uniform(k_whh, (4 * H, H), jnp.float32, -bound, bound),
        "b_ih": jax.random.uniform(k_bih, (4 * H,), jnp.float32, -bound, bound),
        "b_hh": jax.random.uniform(k_bhh, (4 * H,), jnp.float32, -bound, bound),
    }

    x = jax.random.normal(k_x, (B, S, D), jnp.float32)
    lengths = jnp.array([8, 5], dtype=jnp.int32)
    masks = (jnp.arange(S)[None, :] < lengths[:, None]).astype(jnp.float32)  # [B, S]

    out = rnn_forward(x, masks, params)
    out = jax.block_until_ready(out)

    ref = rnn_reference(x, masks, params)
    assert out.shape == (B, S, H)
    # bf16 MXU matmuls, bf16 hidden feedback and bf16 output storage (f32 cell
    # state) -> loosened tolerance vs the f32 reference.
    assert jnp.allclose(out, ref, atol=4e-2, rtol=4e-2), "mismatch vs reference"

    print("KERNEL_OK")
</pallas_src>

<mosaic_0001>
module attributes {stable_mosaic.version = 11 : i64} {
  func.func @lstm_kernel(%arg0: i32, %arg1: i32, %arg2: memref<8x8x16xbf16, #tpu.memory_space<vmem>>, %arg3: memref<16x128xbf16, #tpu.memory_space<vmem>>, %arg4: memref<32x128xbf16, #tpu.memory_space<vmem>>, %arg5: memref<1x128xf32, #tpu.memory_space<vmem>>, %arg6: memref<8x8x32xbf16, #tpu.memory_space<vmem>>, %arg7: memref<8x32xbf16, #tpu.memory_space<vmem>>, %arg8: memref<8x32xf32, #tpu.memory_space<vmem>>, %arg9: memref<8x8x128xf32, #tpu.memory_space<vmem>>) attributes {dimension_semantics = [#tpu.dimension_semantics<parallel>, #tpu.dimension_semantics<arbitrary>], iteration_bounds = array<i64: 1, 1>, scalar_prefetch = 0 : i64, scratch_operands = 3 : i64, tpu.core_type = #tpu.core_type<tc>, window_params = [{transform_indices = @transform_0, window_bounds = array<i64: 8, 8, 16>}, {pipeline_mode = #tpu.pipeline_mode<synchronous>, transform_indices = @transform_1, window_bounds = array<i64: 16, 128>}, {pipeline_mode = #tpu.pipeline_mode<synchronous>, transform_indices = @transform_2, window_bounds = array<i64: 32, 128>}, {pipeline_mode = #tpu.pipeline_mode<synchronous>, transform_indices = @transform_3, window_bounds = array<i64: 1, 128>}, {transform_indices = @transform_4, window_bounds = array<i64: 8, 8, 32>}]} {
    %c0_i32 = arith.constant 0 : i32
    %0 = arith.cmpi eq, %arg1, %c0_i32 : i32
    %1 = arith.extui %0 : i1 to i32
    %c0_i32_0 = arith.constant 0 : i32
    %2 = arith.cmpi ne, %1, %c0_i32_0 : i32
    scf.if %2 {
      %cst_69 = arith.constant 0.000000e+00 : bf16
      %225 = vector.broadcast %cst_69 : bf16 to vector<8x32xbf16>
      %c0_70 = arith.constant 0 : index
      %c0_71 = arith.constant 0 : index
      %226 = vector.load %arg7[%c0_70, %c0_71] : memref<8x32xbf16, #tpu.memory_space<vmem>>, vector<8x32xbf16>
      tpu.vector_store %arg7[%c0_70, %c0_71], %225 {strides = array<i32>} : memref<8x32xbf16, #tpu.memory_space<vmem>>, vector<8x32xbf16>,
      %cst_72 = arith.constant 0.000000e+00 : f32
      %227 = vector.broadcast %cst_72 : f32 to vector<8x32xf32>
      %c0_73 = arith.constant 0 : index
      %c0_74 = arith.constant 0 : index
      %228 = vector.load %arg8[%c0_73, %c0_74] : memref<8x32xf32, #tpu.memory_space<vmem>>, vector<8x32xf32>
      tpu.vector_store %arg8[%c0_73, %c0_74], %227 {strides = array<i32>} : memref<8x32xf32, #tpu.memory_space<vmem>>, vector<8x32xf32>,
    } else {
    }
    %c0 = arith.constant 0 : index
    %c0_1 = arith.constant 0 : index
    %c0_2 = arith.constant 0 : index
    %3 = vector.load %arg2[%c0, %c0_1, %c0_2] : memref<8x8x16xbf16, #tpu.memory_space<vmem>>, vector<8x8x16xbf16>
    %4 = vector.shape_cast %3 : vector<8x8x16xbf16> to vector<64x16xbf16>
    %c0_3 = arith.constant 0 : index
    %c0_4 = arith.constant 0 : index
    %5 = vector.load %arg3[%c0_3, %c0_4] : memref<16x128xbf16, #tpu.memory_space<vmem>>, vector<16x128xbf16>
    %cst = arith.constant dense<0.000000e+00> : vector<64x128xf32>
    %6 = tpu.matmul %4, %5, %cst {dimension_numbers = #tpu.dot_dimension_numbers<[1], [0], [0], [1], [0, 0, 1, 1], [], []>} : vector<64x16xbf16>, vector<16x128xbf16>, vector<64x128xf32> -> vector<64x128xf32>
    %c0_5 = arith.constant 0 : index
    %c0_6 = arith.constant 0 : index
    %7 = vector.load %arg5[%c0_5, %c0_6] : memref<1x128xf32, #tpu.memory_space<vmem>>, vector<1x128xf32>
    %8 = vector.broadcast %7 : vector<1x128xf32> to vector<64x128xf32>
    %9 = arith.addf %6, %8 : vector<64x128xf32>
    %10 = vector.shape_cast %9 : vector<64x128xf32> to vector<8x8x128xf32>
    %c0_7 = arith.constant 0 : index
    %c0_8 = arith.constant 0 : index
    %c0_9 = arith.constant 0 : index
    %11 = vector.load %arg9[%c0_7, %c0_8, %c0_9] : memref<8x8x128xf32, #tpu.memory_space<vmem>>, vector<8x8x128xf32>
    tpu.vector_store %arg9[%c0_7, %c0_8, %c0_9], %10 {strides = array<i32>} : memref<8x8x128xf32, #tpu.memory_space<vmem>>, vector<8x8x128xf32>,
    %c0_10 = arith.constant 0 : index
    %c0_11 = arith.constant 0 : index
    %12 = vector.load %arg4[%c0_10, %c0_11] : memref<32x128xbf16, #tpu.memory_space<vmem>>, vector<32x128xbf16>
    %c0_12 = arith.constant 0 : index
    %c0_13 = arith.constant 0 : index
    %13 = vector.load %arg7[%c0_12, %c0_13] : memref<8x32xbf16, #tpu.memory_space<vmem>>, vector<8x32xbf16>
    %c0_14 = arith.constant 0 : index
    %c0_15 = arith.constant 0 : index
    %14 = vector.load %arg8[%c0_14, %c0_15] : memref<8x32xf32, #tpu.memory_space<vmem>>, vector<8x32xf32>
    %c0_i32_16 = arith.constant 0 : i32
    %15 = arith.index_cast %c0_i32_16 : i32 to index
    %c0_17 = arith.constant 0 : index
    %c0_18 = arith.constant 0 : index
    %16 = vector.load %arg9[%15, %c0_17, %c0_18] : memref<8x8x128xf32, #tpu.memory_space<vmem>>, vector<1x8x128xf32>
    %17 = vector.shape_cast %16 : vector<1x8x128xf32> to vector<8x128xf32>
    %cst_19 = arith.constant dense<0.000000e+00> : vector<8x128xf32>
    %18 = tpu.matmul %13, %12, %cst_19 {dimension_numbers = #tpu.dot_dimension_numbers<[1], [0], [0], [1], [0, 0, 1, 1], [], []>} : vector<8x32xbf16>, vector<32x128xbf16>, vector<8x128xf32> -> vector<8x128xf32>
    %19 = arith.addf %17, %18 : vector<8x128xf32>
    %20 = vector.extract_strided_slice %19 {offsets = [0, 0], sizes = [8, 96], strides = [1, 1]} : vector<8x128xf32> to vector<8x96xf32>
    %21 = arith.negf %20 : vector<8x96xf32>
    %22 = math.exp %21 : vector<8x96xf32>
    %cst_20 = arith.constant 1.000000e+00 : f32
    %23 = vector.broadcast %cst_20 : f32 to vector<8x96xf32>
    %24 = arith.addf %23, %22 : vector<8x96xf32>
    %25 = arith.divf %23, %24 : vector<8x96xf32>
    %26 = vector.extract_strided_slice %19 {offsets = [0, 96], sizes = [8, 32], strides = [1, 1]} : vector<8x128xf32> to vector<8x32xf32>
    %27 = math.tanh %26 : vector<8x32xf32>
    %28 = vector.extract_strided_slice %25 {offsets = [0, 0], sizes = [8, 32], strides = [1, 1]} : vector<8x96xf32> to vector<8x32xf32>
    %29 = vector.extract_strided_slice %25 {offsets = [0, 32], sizes = [8, 32], strides = [1, 1]} : vector<8x96xf32> to vector<8x32xf32>
    %30 = vector.extract_strided_slice %25 {offsets = [0, 64], sizes = [8, 32], strides = [1, 1]} : vector<8x96xf32> to vector<8x32xf32>
    %31 = arith.mulf %29, %14 : vector<8x32xf32>
    %32 = arith.mulf %28, %27 : vector<8x32xf32>
    %33 = arith.addf %31, %32 : vector<8x32xf32>
    %34 = math.tanh %33 : vector<8x32xf32>
    %35 = arith.mulf %30, %34 : vector<8x32xf32>
    %36 = arith.truncf %35 : vector<8x32xf32> to vector<8x32xbf16>
    %37 = arith.index_cast %c0_i32_16 : i32 to index
    %c0_21 = arith.constant 0 : index
    %c0_22 = arith.constant 0 : index
    %38 = vector.load %arg6[%37, %c0_21, %c0_22] : memref<8x8x32xbf16, #tpu.memory_space<vmem>>, vector<1x8x32xbf16>
    %39 = vector.shape_cast %38 : vector<1x8x32xbf16> to vector<8x32xbf16>
    %40 = vector.shape_cast %36 : vector<8x32xbf16> to vector<1x8x32xbf16>
    tpu.vector_store %arg6[%37, %c0_21, %c0_22], %40 {strides = array<i32>} : memref<8x8x32xbf16, #tpu.memory_space<vmem>>, vector<1x8x32xbf16>,
    %c1_i32 = arith.constant 1 : i32
    %41 = arith.index_cast %c1_i32 : i32 to index
    %c0_23 = arith.constant 0 : index
    %c0_24 = arith.constant 0 : index
    %42 = vector.load %arg9[%41, %c0_23, %c0_24] : memref<8x8x128xf32, #tpu.memory_space<vmem>>, vector<1x8x128xf32>
    %43 = vector.shape_cast %42 : vector<1x8x128xf32> to vector<8x128xf32>
    %cst_25 = arith.constant dense<0.000000e+00> : vector<8x128xf32>
    %44 = tpu.matmul %36, %12, %cst_25 {dimension_numbers = #tpu.dot_dimension_numbers<[1], [0], [0], [1], [0, 0, 1, 1], [], []>} : vector<8x32xbf16>, vector<32x128xbf16>, vector<8x128xf32> -> vector<8x128xf32>
    %45 = arith.addf %43, %44 : vector<8x128xf32>
    %46 = vector.extract_strided_slice %45 {offsets = [0, 0], sizes = [8, 96], strides = [1, 1]} : vector<8x128xf32> to vector<8x96xf32>
    %47 = arith.negf %46 : vector<8x96xf32>
    %48 = math.exp %47 : vector<8x96xf32>
    %cst_26 = arith.constant 1.000000e+00 : f32
    %49 = vector.broadcast %cst_26 : f32 to vector<8x96xf32>
    %50 = arith.addf %49, %48 : vector<8x96xf32>
    %51 = arith.divf %49, %50 : vector<8x96xf32>
    %52 = vector.extract_strided_slice %45 {offsets = [0, 96], sizes = [8, 32], strides = [1, 1]} : vector<8x128xf32> to vector<8x32xf32>
    %53 = math.tanh %52 : vector<8x32xf32>
    %54 = vector.extract_strided_slice %51 {offsets = [0, 0], sizes = [8, 32], strides = [1, 1]} : vector<8x96xf32> to vector<8x32xf32>
    %55 = vector.extract_strided_slice %51 {offsets = [0, 32], sizes = [8, 32], strides = [1, 1]} : vector<8x96xf32> to vector<8x32xf32>
    %56 = vector.extract_strided_slice %51 {offsets = [0, 64], sizes = [8, 32], strides = [1, 1]} : vector<8x96xf32> to vector<8x32xf32>
    %57 = arith.mulf %55, %33 : vector<8x32xf32>
    %58 = arith.mulf %54, %53 : vector<8x32xf32>
    %59 = arith.addf %57, %58 : vector<8x32xf32>
    %60 = math.tanh %59 : vector<8x32xf32>
    %61 = arith.mulf %56, %60 : vector<8x32xf32>
    %62 = arith.truncf %61 : vector<8x32xf32> to vector<8x32xbf16>
    %63 = arith.index_cast %c1_i32 : i32 to index
    %c0_27 = arith.constant 0 : index
    %c0_28 = arith.constant 0 : index
    %64 = vector.load %arg6[%63, %c0_27, %c0_28] : memref<8x8x32xbf16, #tpu.memory_space<vmem>>, vector<1x8x32xbf16>
    %65 = vector.shape_cast %64 : vector<1x8x32xbf16> to vector<8x32xbf16>
    %66 = vector.shape_cast %62 : vector<8x32xbf16> to vector<1x8x32xbf16>
    tpu.vector_store %arg6[%63, %c0_27, %c0_28], %66 {strides = array<i32>} : memref<8x8x32xbf16, #tpu.memory_space<vmem>>, vector<1x8x32xbf16>,
    %c2_i32 = arith.constant 2 : i32
    %67 = arith.index_cast %c2_i32 : i32 to index
    %c0_29 = arith.constant 0 : index
    %c0_30 = arith.constant 0 : index
    %68 = vector.load %arg9[%67, %c0_29, %c0_30] : memref<8x8x128xf32, #tpu.memory_space<vmem>>, vector<1x8x128xf32>
    %69 = vector.shape_cast %68 : vector<1x8x128xf32> to vector<8x128xf32>
    %cst_31 = arith.constant dense<0.000000e+00> : vector<8x128xf32>
    %70 = tpu.matmul %62, %12, %cst_31 {dimension_numbers = #tpu.dot_dimension_numbers<[1], [0], [0], [1], [0, 0, 1, 1], [], []>} : vector<8x32xbf16>, vector<32x128xbf16>, vector<8x128xf32> -> vector<8x128xf32>
    %71 = arith.addf %69, %70 : vector<8x128xf32>
    %72 = vector.extract_strided_slice %71 {offsets = [0, 0], sizes = [8, 96], strides = [1, 1]} : vector<8x128xf32> to vector<8x96xf32>
    %73 = arith.negf %72 : vector<8x96xf32>
    %74 = math.exp %73 : vector<8x96xf32>
    %cst_32 = arith.constant 1.000000e+00 : f32
    %75 = vector.broadcast %cst_32 : f32 to vector<8x96xf32>
    %76 = arith.addf %75, %74 : vector<8x96xf32>
    %77 = arith.divf %75, %76 : vector<8x96xf32>
    %78 = vector.extract_strided_slice %71 {offsets = [0, 96], sizes = [8, 32], strides = [1, 1]} : vector<8x128xf32> to vector<8x32xf32>
    %79 = math.tanh %78 : vector<8x32xf32>
    %80 = vector.extract_strided_slice %77 {offsets = [0, 0], sizes = [8, 32], strides = [1, 1]} : vector<8x96xf32> to vector<8x32xf32>
    %81 = vector.extract_strided_slice %77 {offsets = [0, 32], sizes = [8, 32], strides = [1, 1]} : vector<8x96xf32> to vector<8x32xf32>
    %82 = vector.extract_strided_slice %77 {offsets = [0, 64], sizes = [8, 32], strides = [1, 1]} : vector<8x96xf32> to vector<8x32xf32>
    %83 = arith.mulf %81, %59 : vector<8x32xf32>
    %84 = arith.mulf %80, %79 : vector<8x32xf32>
    %85 = arith.addf %83, %84 : vector<8x32xf32>
    %86 = math.tanh %85 : vector<8x32xf32>
    %87 = arith.mulf %82, %86 : vector<8x32xf32>
    %88 = arith.truncf %87 : vector<8x32xf32> to vector<8x32xbf16>
    %89 = arith.index_cast %c2_i32 : i32 to index
    %c0_33 = arith.constant 0 : index
    %c0_34 = arith.constant 0 : index
    %90 = vector.load %arg6[%89, %c0_33, %c0_34] : memref<8x8x32xbf16, #tpu.memory_space<vmem>>, vector<1x8x32xbf16>
    %91 = vector.shape_cast %90 : vector<1x8x32xbf16> to vector<8x32xbf16>
    %92 = vector.shape_cast %88 : vector<8x32xbf16> to vector<1x8x32xbf16>
    tpu.vector_store %arg6[%89, %c0_33, %c0_34], %92 {strides = array<i32>} : memref<8x8x32xbf16, #tpu.memory_space<vmem>>, vector<1x8x32xbf16>,
    %c3_i32 = arith.constant 3 : i32
    %93 = arith.index_cast %c3_i32 : i32 to index
    %c0_35 = arith.constant 0 : index
    %c0_36 = arith.constant 0 : index
    %94 = vector.load %arg9[%93, %c0_35, %c0_36] : memref<8x8x128xf32, #tpu.memory_space<vmem>>, vector<1x8x128xf32>
    %95 = vector.shape_cast %94 : vector<1x8x128xf32> to vector<8x128xf32>
    %cst_37 = arith.constant dense<0.000000e+00> : vector<8x128xf32>
    %96 = tpu.matmul %88, %12, %cst_37 {dimension_numbers = #tpu.dot_dimension_numbers<[1], [0], [0], [1], [0, 0, 1, 1], [], []>} : vector<8x32xbf16>, vector<32x128xbf16>, vector<8x128xf32> -> vector<8x128xf32>
    %97 = arith.addf %95, %96 : vector<8x128xf32>
    %98 = vector.extract_strided_slice %97 {offsets = [0, 0], sizes = [8, 96], strides = [1, 1]} : vector<8x128xf32> to vector<8x96xf32>
    %99 = arith.negf %98 : vector<8x96xf32>
    %100 = math.exp %99 : vector<8x96xf32>
    %cst_38 = arith.constant 1.000000e+00 : f32
    %101 = vector.broadcast %cst_38 : f32 to vector<8x96xf32>
    %102 = arith.addf %101, %100 : vector<8x96xf32>
    %103 = arith.divf %101, %102 : vector<8x96xf32>
    %104 = vector.extract_strided_slice %97 {offsets = [0, 96], sizes = [8, 32], strides = [1, 1]} : vector<8x128xf32> to vector<8x32xf32>
    %105 = math.tanh %104 : vector<8x32xf32>
    %106 = vector.extract_strided_slice %103 {offsets = [0, 0], sizes = [8, 32], strides = [1, 1]} : vector<8x96xf32> to vector<8x32xf32>
    %107 = vector.extract_strided_slice %103 {offsets = [0, 32], sizes = [8, 32], strides = [1, 1]} : vector<8x96xf32> to vector<8x32xf32>
    %108 = vector.extract_strided_slice %103 {offsets = [0, 64], sizes = [8, 32], strides = [1, 1]} : vector<8x96xf32> to vector<8x32xf32>
    %109 = arith.mulf %107, %85 : vector<8x32xf32>
    %110 = arith.mulf %106, %105 : vector<8x32xf32>
    %111 = arith.addf %109, %110 : vector<8x32xf32>
    %112 = math.tanh %111 : vector<8x32xf32>
    %113 = arith.mulf %108, %112 : vector<8x32xf32>
    %114 = arith.truncf %113 : vector<8x32xf32> to vector<8x32xbf16>
    %115 = arith.index_cast %c3_i32 : i32 to index
    %c0_39 = arith.constant 0 : index
    %c0_40 = arith.constant 0 : index
    %116 = vector.load %arg6[%115, %c0_39, %c0_40] : memref<8x8x32xbf16, #tpu.memory_space<vmem>>, vector<1x8x32xbf16>
    %117 = vector.shape_cast %116 : vector<1x8x32xbf16> to vector<8x32xbf16>
    %118 = vector.shape_cast %114 : vector<8x32xbf16> to vector<1x8x32xbf16>
    tpu.vector_store %arg6[%115, %c0_39, %c0_40], %118 {strides = array<i32>} : memref<8x8x32xbf16, #tpu.memory_space<vmem>>, vector<1x8x32xbf16>,
    %c4_i32 = arith.constant 4 : i32
    %119 = arith.index_cast %c4_i32 : i32 to index
    %c0_41 = arith.constant 0 : index
    %c0_42 = arith.constant 0 : index
    %120 = vector.load %arg9[%119, %c0_41, %c0_42] : memref<8x8x128xf32, #tpu.memory_space<vmem>>, vector<1x8x128xf32>
    %121 = vector.shape_cast %120 : vector<1x8x128xf32> to vector<8x128xf32>
    %cst_43 = arith.constant dense<0.000000e+00> : vector<8x128xf32>
    %122 = tpu.matmul %114, %12, %cst_43 {dimension_numbers = #tpu.dot_dimension_numbers<[1], [0], [0], [1], [0, 0, 1, 1], [], []>} : vector<8x32xbf16>, vector<32x128xbf16>, vector<8x128xf32> -> vector<8x128xf32>
    %123 = arith.addf %121, %122 : vector<8x128xf32>
    %124 = vector.extract_strided_slice %123 {offsets = [0, 0], sizes = [8, 96], strides = [1, 1]} : vector<8x128xf32> to vector<8x96xf32>
    %125 = arith.negf %124 : vector<8x96xf32>
    %126 = math.exp %125 : vector<8x96xf32>
    %cst_44 = arith.constant 1.000000e+00 : f32
    %127 = vector.broadcast %cst_44 : f32 to vector<8x96xf32>
    %128 = arith.addf %127, %126 : vector<8x96xf32>
    %129 = arith.divf %127, %128 : vector<8x96xf32>
    %130 = vector.extract_strided_slice %123 {offsets = [0, 96], sizes = [8, 32], strides = [1, 1]} : vector<8x128xf32> to vector<8x32xf32>
    %131 = math.tanh %130 : vector<8x32xf32>
    %132 = vector.extract_strided_slice %129 {offsets = [0, 0], sizes = [8, 32], strides = [1, 1]} : vector<8x96xf32> to vector<8x32xf32>
    %133 = vector.extract_strided_slice %129 {offsets = [0, 32], sizes = [8, 32], strides = [1, 1]} : vector<8x96xf32> to vector<8x32xf32>
    %134 = vector.extract_strided_slice %129 {offsets = [0, 64], sizes = [8, 32], strides = [1, 1]} : vector<8x96xf32> to vector<8x32xf32>
    %135 = arith.mulf %133, %111 : vector<8x32xf32>
    %136 = arith.mulf %132, %131 : vector<8x32xf32>
    %137 = arith.addf %135, %136 : vector<8x32xf32>
    %138 = math.tanh %137 : vector<8x32xf32>
    %139 = arith.mulf %134, %138 : vector<8x32xf32>
    %140 = arith.truncf %139 : vector<8x32xf32> to vector<8x32xbf16>
    %141 = arith.index_cast %c4_i32 : i32 to index
    %c0_45 = arith.constant 0 : index
    %c0_46 = arith.constant 0 : index
    %142 = vector.load %arg6[%141, %c0_45, %c0_46] : memref<8x8x32xbf16, #tpu.memory_space<vmem>>, vector<1x8x32xbf16>
    %143 = vector.shape_cast %142 : vector<1x8x32xbf16> to vector<8x32xbf16>
    %144 = vector.shape_cast %140 : vector<8x32xbf16> to vector<1x8x32xbf16>
    tpu.vector_store %arg6[%141, %c0_45, %c0_46], %144 {strides = array<i32>} : memref<8x8x32xbf16, #tpu.memory_space<vmem>>, vector<1x8x32xbf16>,
    %c5_i32 = arith.constant 5 : i32
    %145 = arith.index_cast %c5_i32 : i32 to index
    %c0_47 = arith.constant 0 : index
    %c0_48 = arith.constant 0 : index
    %146 = vector.load %arg9[%145, %c0_47, %c0_48] : memref<8x8x128xf32, #tpu.memory_space<vmem>>, vector<1x8x128xf32>
    %147 = vector.shape_cast %146 : vector<1x8x128xf32> to vector<8x128xf32>
    %cst_49 = arith.constant dense<0.000000e+00> : vector<8x128xf32>
    %148 = tpu.matmul %140, %12, %cst_49 {dimension_numbers = #tpu.dot_dimension_numbers<[1], [0], [0], [1], [0, 0, 1, 1], [], []>} : vector<8x32xbf16>, vector<32x128xbf16>, vector<8x128xf32> -> vector<8x128xf32>
    %149 = arith.addf %147, %148 : vector<8x128xf32>
    %150 = vector.extract_strided_slice %149 {offsets = [0, 0], sizes = [8, 96], strides = [1, 1]} : vector<8x128xf32> to vector<8x96xf32>
    %151 = arith.negf %150 : vector<8x96xf32>
    %152 = math.exp %151 : vector<8x96xf32>
    %cst_50 = arith.constant 1.000000e+00 : f32
    %153 = vector.broadcast %cst_50 : f32 to vector<8x96xf32>
    %154 = arith.addf %153, %152 : vector<8x96xf32>
    %155 = arith.divf %153, %154 : vector<8x96xf32>
    %156 = vector.extract_strided_slice %149 {offsets = [0, 96], sizes = [8, 32], strides = [1, 1]} : vector<8x128xf32> to vector<8x32xf32>
    %157 = math.tanh %156 : vector<8x32xf32>
    %158 = vector.extract_strided_slice %155 {offsets = [0, 0], sizes = [8, 32], strides = [1, 1]} : vector<8x96xf32> to vector<8x32xf32>
    %159 = vector.extract_strided_slice %155 {offsets = [0, 32], sizes = [8, 32], strides = [1, 1]} : vector<8x96xf32> to vector<8x32xf32>
    %160 = vector.extract_strided_slice %155 {offsets = [0, 64], sizes = [8, 32], strides = [1, 1]} : vector<8x96xf32> to vector<8x32xf32>
    %161 = arith.mulf %159, %137 : vector<8x32xf32>
    %162 = arith.mulf %158, %157 : vector<8x32xf32>
    %163 = arith.addf %161, %162 : vector<8x32xf32>
    %164 = math.tanh %163 : vector<8x32xf32>
    %165 = arith.mulf %160, %164 : vector<8x32xf32>
    %166 = arith.truncf %165 : vector<8x32xf32> to vector<8x32xbf16>
    %167 = arith.index_cast %c5_i32 : i32 to index
    %c0_51 = arith.constant 0 : index
    %c0_52 = arith.constant 0 : index
    %168 = vector.load %arg6[%167, %c0_51, %c0_52] : memref<8x8x32xbf16, #tpu.memory_space<vmem>>, vector<1x8x32xbf16>
    %169 = vector.shape_cast %168 : vector<1x8x32xbf16> to vector<8x32xbf16>
    %170 = vector.shape_cast %166 : vector<8x32xbf16> to vector<1x8x32xbf16>
    tpu.vector_store %arg6[%167, %c0_51, %c0_52], %170 {strides = array<i32>} : memref<8x8x32xbf16, #tpu.memory_space<vmem>>, vector<1x8x32xbf16>,
    %c6_i32 = arith.constant 6 : i32
    %171 = arith.index_cast %c6_i32 : i32 to index
    %c0_53 = arith.constant 0 : index
    %c0_54 = arith.constant 0 : index
    %172 = vector.load %arg9[%171, %c0_53, %c0_54] : memref<8x8x128xf32, #tpu.memory_space<vmem>>, vector<1x8x128xf32>
    %173 = vector.shape_cast %172 : vector<1x8x128xf32> to vector<8x128xf32>
    %cst_55 = arith.constant dense<0.000000e+00> : vector<8x128xf32>
    %174 = tpu.matmul %166, %12, %cst_55 {dimension_numbers = #tpu.dot_dimension_numbers<[1], [0], [0], [1], [0, 0, 1, 1], [], []>} : vector<8x32xbf16>, vector<32x128xbf16>, vector<8x128xf32> -> vector<8x128xf32>
    %175 = arith.addf %173, %174 : vector<8x128xf32>
    %176 = vector.extract_strided_slice %175 {offsets = [0, 0], sizes = [8, 96], strides = [1, 1]} : vector<8x128xf32> to vector<8x96xf32>
    %177 = arith.negf %176 : vector<8x96xf32>
    %178 = math.exp %177 : vector<8x96xf32>
    %cst_56 = arith.constant 1.000000e+00 : f32
    %179 = vector.broadcast %cst_56 : f32 to vector<8x96xf32>
    %180 = arith.addf %179, %178 : vector<8x96xf32>
    %181 = arith.divf %179, %180 : vector<8x96xf32>
    %182 = vector.extract_strided_slice %175 {offsets = [0, 96], sizes = [8, 32], strides = [1, 1]} : vector<8x128xf32> to vector<8x32xf32>
    %183 = math.tanh %182 : vector<8x32xf32>
    %184 = vector.extract_strided_slice %181 {offsets = [0, 0], sizes = [8, 32], strides = [1, 1]} : vector<8x96xf32> to vector<8x32xf32>
    %185 = vector.extract_strided_slice %181 {offsets = [0, 32], sizes = [8, 32], strides = [1, 1]} : vector<8x96xf32> to vector<8x32xf32>
    %186 = vector.extract_strided_slice %181 {offsets = [0, 64], sizes = [8, 32], strides = [1, 1]} : vector<8x96xf32> to vector<8x32xf32>
    %187 = arith.mulf %185, %163 : vector<8x32xf32>
    %188 = arith.mulf %184, %183 : vector<8x32xf32>
    %189 = arith.addf %187, %188 : vector<8x32xf32>
    %190 = math.tanh %189 : vector<8x32xf32>
    %191 = arith.mulf %186, %190 : vector<8x32xf32>
    %192 = arith.truncf %191 : vector<8x32xf32> to vector<8x32xbf16>
    %193 = arith.index_cast %c6_i32 : i32 to index
    %c0_57 = arith.constant 0 : index
    %c0_58 = arith.constant 0 : index
    %194 = vector.load %arg6[%193, %c0_57, %c0_58] : memref<8x8x32xbf16, #tpu.memory_space<vmem>>, vector<1x8x32xbf16>
    %195 = vector.shape_cast %194 : vector<1x8x32xbf16> to vector<8x32xbf16>
    %196 = vector.shape_cast %192 : vector<8x32xbf16> to vector<1x8x32xbf16>
    tpu.vector_store %arg6[%193, %c0_57, %c0_58], %196 {strides = array<i32>} : memref<8x8x32xbf16, #tpu.memory_space<vmem>>, vector<1x8x32xbf16>,
    %c7_i32 = arith.constant 7 : i32
    %197 = arith.index_cast %c7_i32 : i32 to index
    %c0_59 = arith.constant 0 : index
    %c0_60 = arith.constant 0 : index
    %198 = vector.load %arg9[%197, %c0_59, %c0_60] : memref<8x8x128xf32, #tpu.memory_space<vmem>>, vector<1x8x128xf32>
    %199 = vector.shape_cast %198 : vector<1x8x128xf32> to vector<8x128xf32>
    %cst_61 = arith.constant dense<0.000000e+00> : vector<8x128xf32>
    %200 = tpu.matmul %192, %12, %cst_61 {dimension_numbers = #tpu.dot_dimension_numbers<[1], [0], [0], [1], [0, 0, 1, 1], [], []>} : vector<8x32xbf16>, vector<32x128xbf16>, vector<8x128xf32> -> vector<8x128xf32>
    %201 = arith.addf %199, %200 : vector<8x128xf32>
    %202 = vector.extract_strided_slice %201 {offsets = [0, 0], sizes = [8, 96], strides = [1, 1]} : vector<8x128xf32> to vector<8x96xf32>
    %203 = arith.negf %202 : vector<8x96xf32>
    %204 = math.exp %203 : vector<8x96xf32>
    %cst_62 = arith.constant 1.000000e+00 : f32
    %205 = vector.broadcast %cst_62 : f32 to vector<8x96xf32>
    %206 = arith.addf %205, %204 : vector<8x96xf32>
    %207 = arith.divf %205, %206 : vector<8x96xf32>
    %208 = vector.extract_strided_slice %201 {offsets = [0, 96], sizes = [8, 32], strides = [1, 1]} : vector<8x128xf32> to vector<8x32xf32>
    %209 = math.tanh %208 : vector<8x32xf32>
    %210 = vector.extract_strided_slice %207 {offsets = [0, 0], sizes = [8, 32], strides = [1, 1]} : vector<8x96xf32> to vector<8x32xf32>
    %211 = vector.extract_strided_slice %207 {offsets = [0, 32], sizes = [8, 32], strides = [1, 1]} : vector<8x96xf32> to vector<8x32xf32>
    %212 = vector.extract_strided_slice %207 {offsets = [0, 64], sizes = [8, 32], strides = [1, 1]} : vector<8x96xf32> to vector<8x32xf32>
    %213 = arith.mulf %211, %189 : vector<8x32xf32>
    %214 = arith.mulf %210, %209 : vector<8x32xf32>
    %215 = arith.addf %213, %214 : vector<8x32xf32>
    %216 = math.tanh %215 : vector<8x32xf32>
    %217 = arith.mulf %212, %216 : vector<8x32xf32>
    %218 = arith.truncf %217 : vector<8x32xf32> to vector<8x32xbf16>
    %219 = arith.index_cast %c7_i32 : i32 to index
    %c0_63 = arith.constant 0 : index
    %c0_64 = arith.constant 0 : index
    %220 = vector.load %arg6[%219, %c0_63, %c0_64] : memref<8x8x32xbf16, #tpu.memory_space<vmem>>, vector<1x8x32xbf16>
    %221 = vector.shape_cast %220 : vector<1x8x32xbf16> to vector<8x32xbf16>
    %222 = vector.shape_cast %218 : vector<8x32xbf16> to vector<1x8x32xbf16>
    tpu.vector_store %arg6[%219, %c0_63, %c0_64], %222 {strides = array<i32>} : memref<8x8x32xbf16, #tpu.memory_space<vmem>>, vector<1x8x32xbf16>,
    %c8_i32 = arith.constant 8 : i32
    %c0_65 = arith.constant 0 : index
    %c0_66 = arith.constant 0 : index
    %223 = vector.load %arg7[%c0_65, %c0_66] : memref<8x32xbf16, #tpu.memory_space<vmem>>, vector<8x32xbf16>
    tpu.vector_store %arg7[%c0_65, %c0_66], %218 {strides = array<i32>} : memref<8x32xbf16, #tpu.memory_space<vmem>>, vector<8x32xbf16>,
    %c0_67 = arith.constant 0 : index
    %c0_68 = arith.constant 0 : index
    %224 = vector.load %arg8[%c0_67, %c0_68] : memref<8x32xf32, #tpu.memory_space<vmem>>, vector<8x32xf32>
    tpu.vector_store %arg8[%c0_67, %c0_68], %215 {strides = array<i32>} : memref<8x32xf32, #tpu.memory_space<vmem>>, vector<8x32xf32>,
    return
  }
  func.func @transform_0(%arg0: i32, %arg1: i32) -> (i32, i32, i32) {
    %c0_i32 = arith.constant 0 : i32
    %c0_i32_0 = arith.constant 0 : i32
    return %arg1, %arg0, %c0_i32 : i32, i32, i32
  }
  func.func @transform_1(%arg0: i32, %arg1: i32) -> (i32, i32) {
    %c0_i32 = arith.constant 0 : i32
    %c0_i32_0 = arith.constant 0 : i32
    %c0_i32_1 = arith.constant 0 : i32
    return %c0_i32, %c0_i32_0 : i32, i32
  }
  func.func @transform_2(%arg0: i32, %arg1: i32) -> (i32, i32) {
    %c0_i32 = arith.constant 0 : i32
    %c0_i32_0 = arith.constant 0 : i32
    %c0_i32_1 = arith.constant 0 : i32
    return %c0_i32, %c0_i32_0 : i32, i32
  }
  func.func @transform_3(%arg0: i32, %arg1: i32) -> (i32, i32) {
    %c0_i32 = arith.constant 0 : i32
    %c0_i32_0 = arith.constant 0 : i32
    %c0_i32_1 = arith.constant 0 : i32
    return %c0_i32, %c0_i32_0 : i32, i32
  }
  func.func @transform_4(%arg0: i32, %arg1: i32) -> (i32, i32, i32) {
    %c0_i32 = arith.constant 0 : i32
    %c0_i32_0 = arith.constant 0 : i32
    return %arg1, %arg0, %c0_i32 : i32, i32, i32
  }
}

</mosaic_0001>

<bundles_post_ra>
// kernel: tpu_custom_call.1
= control target key start
LH: loop header
LB: loop body
LE: loop exit
PB: predicated region body
PF: predicated region fallthrough
CT: control target
= control target key end

     0   :  { %9 = vsyncpa [#allocation6], 0  ;;  %s1436_s0 = inlined_call_operand.hbm [shape: bf16[8,8,16], index: 0, kind: input, shape index: {}]   ;;  %s1437_s1 = inlined_call_operand.hbm [shape: bf16[16,128], index: 1, kind: input, shape index: {}]   ;;  %s1438_s2 = inlined_call_operand.hbm [shape: bf16[32,128], index: 2, kind: input, shape index: {}]   ;;  %s1439_s3 = inlined_call_operand.vmem [shape: f32[1,128], index: 3, kind: input, shape index: {}]   ;;  %s1440_s4 = inlined_call_operand.hbm [shape: bf16[8,8,32], index: 4, kind: output, shape index: {}]  }
   0x1   :  { %10 = vsyncpa [#allocation9], 0 }
   0x2   :  { %11 = vsyncpa [#allocation7], 0  ;;  %s1204_s15 = smov [#allocation8]   ;;  %s1205_s17 = smov [#allocation5]  }
   0x3   :  { %s29_s16 = sshll.u32 %s1204_s15, 4  ;;  %s17_s18 = sshll.u32 %s1205_s17, 4  ;;  %s30_s16 = int_to_ptr.vmem [resolvable:$true] %s29_s16  ;;  %s18_s18 = int_to_ptr.vmem [resolvable:$true] %s17_s18 }
   0x4   :  { %s1126_s19 = scalar_lea.vmem %s30_s16, 128  ;;  %p1131_p1 = scmp.lt.s32.totalorder %s30_s16, %s30_s16 }
   0x5   :  { %p1127_p0 = scmp.ne.s32.totalorder %s30_s16, %s1126_s19  ;;  %p1132_p2 = scmp.lt.s32.totalorder %s1126_s19, %s1126_s19 }
   0x7   :  { %p1133_p3 = por %p1132_p2, %p1131_p1 }
   0x9   :  { %p1134_p4 = pnand %p1133_p3, %p1127_p0 }
   0xb   :  { %1137 = shalt.err (!%p1134_p4)
}
   0xc   :  { %s1206_s20 = smov 64   ;;  %s1207_s21 = smov 4  }
   0xd   :  { %35 = dma.hbm_to_vmem [thread:$0]  %s1437_s1, 128, %s30_s16, [#allocation9], %s1206_s20, %s1206_s20, %s1207_s21  }
   0xe   :  { %s1146_s24 = scalar_lea.vmem %s18_s18, 512  ;;  %p1151_p6 = scmp.lt.s32.totalorder %s18_s18, %s18_s18 }
   0xf   :  { %p1147_p5 = scmp.ne.s32.totalorder %s18_s18, %s1146_s24  ;;  %p1152_p7 = scmp.lt.s32.totalorder %s1146_s24, %s1146_s24 }
  0x11   :  { %p1153_p8 = por %p1152_p7, %p1151_p6 }
  0x13   :  { %p1154_p9 = pnand %p1153_p8, %p1147_p5 }
  0x15   :  { %1157 = shalt.err (!%p1154_p9)
}
  0x16   :  { %23 = dma.hbm_to_vmem [thread:$0]  %s1436_s0, 512, %s18_s18, [#allocation6], %s1206_s20, %s1206_s20, %s1207_s21  }
  0x17   :  { %s1208_s27 = smov [#allocation10]  }
  0x18   :  { %s41_s28 = sshll.u32 %s1208_s27, 4  ;;  %s42_s28 = int_to_ptr.vmem [resolvable:$true] %s41_s28 }
  0x19   :  { %s1166_s29 = scalar_lea.vmem %s42_s28, 256  ;;  %p1171_p11 = scmp.lt.s32.totalorder %s42_s28, %s42_s28 }
  0x1a   :  { %p1167_p10 = scmp.ne.s32.totalorder %s42_s28, %s1166_s29  ;;  %p1172_p12 = scmp.lt.s32.totalorder %s1166_s29, %s1166_s29 }
  0x1c   :  { %p1173_p13 = por %p1172_p12, %p1171_p11 }
  0x1e   :  { %p1174_p0 = pnand %p1173_p13, %p1167_p10 }
  0x20   :  { %1177 = shalt.err (!%p1174_p0)
}
  0x21   :  { %47 = dma.hbm_to_vmem [thread:$0]  %s1438_s2, 256, %s42_s28, [#allocation9], %s1206_s20, %s1206_s20, %s1207_s21  }
  0x22   :  { %1198 = dma.done.wait [#allocation6], 512  }
  0x23   :  { %1199 = vsyncadd [#allocation6], 4294966784 }
  0x24   :  { %1200 = dma.done.wait [#allocation9], 384  }
  0x25   :  { %1201 = vsyncadd [#allocation9], 4294966912  ;;  %vm64_vm0 = vcmask 257024   ;;  %v1209_v0 = vmov 0.0   ;;  %vm1210_vm1 = vmmov 0   ;;  %vm66_vm2 = vcmask 261120  }
  0x26   :  { %972 = vmatprep.subr.bf16.mxu1 %v1209_v0  ;;  %976 = vmatprep.mubr.msk.bf16.mxu1 %vm1210_vm1, %v1209_v0  ;;  %v1211_v1 = vmov 0   ;;  %67 = vst.msk [vmem:[#allocation3] sm:$0xff] %vm66_vm2, %v1209_v0  ;;  %v1047_v2 = vld [vmem:[#allocation8] sm:$0xff]   ;;  %v1264_v3 = vld [vmem:[#allocation10 + $0x8] sm:$0xff]   ;;  %vm111_vm3 = vcmask 130048   ;;  %v1050_v5 = vld [vmem:[#allocation5 + $0x8] sm:$0xff]  }
  0x27   :  { %65 = vst.msk [vmem:[#allocation2] sm:$0xf] %vm64_vm0, %v1211_v1  ;;  %962 = vmatprep.subr.bf16.mxu0 %v1047_v2  ;;  %v1049_v4 = vld [vmem:[#allocation5] sm:$0xff]   ;;  %973 = vmatpush3.bf16.msra.mxu1 %v1264_v3  ;;  %v1269_v6 = vld [vmem:[#allocation10] sm:$0xff]   ;;  %v1291_v9 = vld [vmem:[%s1439_s3] ss:$0 sm:$0xff] }
  0x28   :  { %963 = vmatpush3.bf16.msra.mxu0 %v1047_v2  ;;  %964 = vmatprep.mubr.msk.bf16.mxu0 %vm111_vm3, %v1049_v4  ;;  %s1212_s5 = smov 32   ;;  %v1052_v52 = vld [vmem:[#allocation5 + $0x10] sm:$0xff]   ;;  %v1053_v53 = vld [vmem:[#allocation5 + $0x18] sm:$0xff]   ;;  %s1213_s3 = smov 96  }
  0x29   :  { %974 = vmatprep.subr.bf16.mxu1 %v1209_v0  ;;  %988 = vmatprep.subr.bf16.mxu0 %v1209_v0  ;;  %s1214_s6 = smov [#allocation11]  }
  0x2a   :  { %s876_s7 = sshll.u32 %s1214_s6, 4  ;;  %s877_s7 = int_to_ptr.vmem [resolvable:$true] %s876_s7 }
  0x2b   :  { %965 = vmatmul.mubr.msk.bf16.vlgmr.msra.gmra.mxu0 %vm111_vm3, %v1050_v5  ;;  %975 = vmatpush3.bf16.msra.mxu1 %v1269_v6  ;;  %s1178_s8 = scalar_lea.vmem %s877_s7, 512  ;;  %p1183_p2 = scmp.lt.s32.totalorder %s877_s7, %s877_s7 }
  0x2c   :  { %989 = vmatpush3.bf16.msra.mxu0 %v1264_v3  ;;  %980 = vmatprep.subr.bf16.mxu1 %v1209_v0  ;;  %p1179_p1 = scmp.ne.s32.totalorder %s877_s7, %s1178_s8  ;;  %p1184_p3 = scmp.lt.s32.totalorder %s1178_s8, %s1178_s8 }
  0x2d   :  { %990 = vmatprep.subr.bf16.mxu0 %v1209_v0  ;;  %v202_v18 = vld [vmem:[#allocation3] sm:$0xff]  ;;  %968 = vmatprep.mubr.msk.bf16.mxu0 %vm111_vm3, %v1052_v52 }
  0x2e   :  { %v201_v7 = vld [vmem:[#allocation2] sm:$0xf]  ;;  %p1185_p4 = por %p1184_p3, %p1183_p2 }
  0x2f   :  { %977 = vmatmul.mubr.msk.bf16.vlgmr.msra.gmra.mxu1 %vm66_vm2, %v201_v7 }
  0x30   :  { %981 = vmatpush3.bf16.msra.mxu1 %v1264_v3  ;;  %984 = vmatprep.mubr.msk.bf16.mxu1 %vm1210_vm1, %v1209_v0  ;;  %p1186_p5 = pnand %p1185_p4, %p1179_p1 }
  0x31   :  { %982 = vmatprep.subr.bf16.mxu1 %v1209_v0  ;;  %991 = vmatpush3.bf16.msra.mxu0 %v1269_v6 }
  0x32   :  { %1004 = vmatprep.subr.bf16.mxu0 %v1209_v0 }
  0x33   :  { %969 = vmatmul.mubr.msk.bf16.gmra.mxu0 %vm111_vm3, %v1053_v53 }
  0x34   :  { %983 = vmatpush3.bf16.msra.mxu1 %v1269_v6  ;;  %992 = vmatprep.mubr.msk.bf16.mxu0 %vm1210_vm1, %v1209_v0 }
  0x35   :  { %996 = vmatprep.subr.bf16.mxu1 %v1209_v0 }
  0xeb   :  { %v1286_v8 = vpop.f32.mrf.mxu0 }
  0xec   :  { %v167_v63 = vadd.f32 %v1286_v8, %v1291_v9 }
  0xed   :  { %v158_v10 = vpop.f32.mrf.mxu0 }
  0xee   :  { %v159_v11 = vadd.f32 %v1291_v9, %v158_v10 }
  0xef   :  { %v254_v12 = vpop.f32.mrf.mxu1  ;;  %v1309_v34 = vpop.f32.mrf.mxu0 }
  0xf0   :  { %v260_v13 = vadd.f32 %v254_v12, %v159_v11 }
  0xf1   :  { %v978_v14 = vpop.f32.mrf.mxu1  ;;  %v161_v35 = vpop.f32.mrf.mxu0 }
  0xf2   :  { %1054 = vtanh.f32 %v260_v13  ;;  %v902_v19 = vmul.f32 -1.442695, %v260_v13  ;;  %v162_v36 = vadd.f32 %v1291_v9, %v161_v35 }
  0xf3   :  { %v257_v15 = vpop.f32.mrf.mxu1  ;;  %v1330_v59 = vpop.f32.mrf.mxu0 }
  0xf4   :  { %1056 = vpow2.f32 %v902_v19 }
  0xf5   :  { %v979_v16 = vpop.f32.mrf.mxu1  ;;  %v1332_v60 = vpop.f32.mrf.mxu0 }
  0xf7   :  { %v1334_v61 = vpop.f32.mrf.mxu0 }
  0xf9   :  { %v1336_v62 = vpop.f32.mrf.mxu0 }
  0xff   :  { %v1055_v17 = vpop.eup %1054 }
 0x100   :  { %274 = vrot.lane.b32.xlu0 %v1055_v17, %s1212_s5 }
 0x101   :  { %v1057_v20 = vpop.eup %1056 }
 0x102   :  { %v264_v21 = vadd.f32 1.0, %v1057_v20 }
 0x104   :  { %269 = vrot.lane.b32.xlu0 %v202_v18, %s1212_s5  ;;  %1058 = vrcp.f32 %v264_v21 }
 0x111   :  { %v1059_v22 = vpop.eup %1058 }
 0x172   :  { %v275_v23 = vpop.permute.xlu0 %274 }
 0x173   :  { %v277_v24 = vmul.f32 %v1059_v22, %v275_v23 }
 0x175   :  { %279 = vrot.lane.b32.xlu1 %v277_v24, %s1212_s5  ;;  %v170_v24 = vadd.f32 %v1309_v34, %v1291_v9 }
 0x176   :  { %v270_v25 = vpop.permute.xlu0 %269 }
 0x177   :  { %v272_v26 = vmul.f32 %v1059_v22, %v270_v25 }
 0x1e7   :  { %v280_v27 = vpop.permute.xlu1 %279 }
 0x1e8   :  { %v282_v28 = vadd.f32 %v280_v27, %v272_v26 }
 0x1ea   :  { %1060 = vtanh.f32 %v282_v28 }
 0x1f7   :  { %v1061_v29 = vpop.eup %1060 }
 0x1f8   :  { %285 = vrot.lane.b32.xlu1 %v1061_v29, %s1212_s5 }
 0x26a   :  { %v286_v30 = vpop.permute.xlu1 %285 }
 0x26b   :  { %v288_v31 = vmul.f32 %v1059_v22, %v286_v30 }
 0x26d   :  { %v1298_v32 = vpack.c.bf16 %v288_v31, %v288_v31 }
 0x26f   :  { %300 = vrot.lane.b32.xlu0 %v1298_v32, %s1206_s20 }
 0x2e1   :  { %v301_v33 = vpop.permute.xlu0 %300 }
 0x2e2   :  { %985 = vmatmul.mubr.msk.bf16.vlgmr.msra.gmra.mxu1 %vm66_vm2, %v301_v33 }
 0x2e3   :  { %997 = vmatpush3.bf16.msra.mxu1 %v1264_v3  ;;  %1000 = vmatprep.mubr.msk.bf16.mxu1 %vm1210_vm1, %v1209_v0 }
 0x2e4   :  { %998 = vmatprep.subr.bf16.mxu1 %v1209_v0 }
 0x2e7   :  { %999 = vmatpush3.bf16.msra.mxu1 %v1269_v6 }
 0x2e8   :  { %1012 = vmatprep.subr.bf16.mxu1 %v1209_v0 }
 0x3a2   :  { %v339_v37 = vpop.f32.mrf.mxu1 }
 0x3a3   :  { %v345_v38 = vadd.f32 %v339_v37, %v162_v36 }
 0x3a4   :  { %v986_v39 = vpop.f32.mrf.mxu1 }
 0x3a5   :  { %1062 = vtanh.f32 %v345_v38  ;;  %v905_v43 = vmul.f32 -1.442695, %v345_v38 }
 0x3a6   :  { %v342_v40 = vpop.f32.mrf.mxu1 }
 0x3a7   :  { %1064 = vpow2.f32 %v905_v43 }
 0x3a8   :  { %v987_v41 = vpop.f32.mrf.mxu1 }
 0x3b2   :  { %v1063_v42 = vpop.eup %1062 }
 0x3b3   :  { %355 = vrot.lane.b32.xlu1 %v1063_v42, %s1212_s5 }
 0x3b4   :  { %v1065_v44 = vpop.eup %1064 }
 0x3b5   :  { %v349_v45 = vadd.f32 1.0, %v1065_v44 }
 0x3b7   :  { %1066 = vrcp.f32 %v349_v45 }
 0x3c4   :  { %v1067_v46 = vpop.eup %1066 }
 0x3c5   :  { %v353_v49 = vmul.f32 %v1067_v46, %v282_v28 }
 0x425   :  { %v356_v47 = vpop.permute.xlu1 %355 }
 0x426   :  { %v358_v48 = vmul.f32 %v1067_v46, %v356_v47 }
 0x428   :  { %360 = vrot.lane.b32.xlu0 %v358_v48, %s1212_s5 }
 0x49a   :  { %v361_v50 = vpop.permute.xlu0 %360 }
 0x49b   :  { %v363_v51 = vadd.f32 %v361_v50, %v353_v49 }
 0x49d   :  { %1068 = vtanh.f32 %v363_v51 }
 0x4aa   :  { %v1069_v54 = vpop.eup %1068 }
 0x4ab   :  { %366 = vrot.lane.b32.xlu1 %v1069_v54, %s1212_s5 }
 0x51d   :  { %v367_v55 = vpop.permute.xlu1 %366 }
 0x51e   :  { %v369_v56 = vmul.f32 %v1067_v46, %v367_v55  ;;  %v175_v46 = vadd.f32 %v1291_v9, %v1332_v60 }
 0x520   :  { %v1319_v57 = vpack.c.bf16 %v369_v56, %v369_v56 }
 0x522   :  { %381 = vrot.lane.b32.xlu0 %v1319_v57, %s1206_s20 }
 0x594   :  { %v382_v58 = vpop.permute.xlu0 %381 }
 0x595   :  { %993 = vmatmul.mubr.msk.bf16.vlgmr.msra.gmra.mxu0 %vm66_vm2, %v382_v58 }
 0x596   :  { %1005 = vmatpush3.bf16.msra.mxu0 %v1264_v3  ;;  %1008 = vmatprep.mubr.msk.bf16.mxu0 %vm1210_vm1, %v1209_v0 }
 0x597   :  { %1006 = vmatprep.subr.bf16.mxu0 %v1209_v0 }
 0x59a   :  { %1007 = vmatpush3.bf16.msra.mxu0 %v1269_v6 }
 0x59b   :  { %1020 = vmatprep.subr.bf16.mxu0 %v1209_v0 }
 0x655   :  { %v420_v1 = vpop.f32.mrf.mxu0 }
 0x656   :  { %v426_v2 = vadd.f32 %v420_v1, %v167_v63 }
 0x657   :  { %v994_v4 = vpop.f32.mrf.mxu0 }
 0x658   :  { %1070 = vtanh.f32 %v426_v2  ;;  %v908_v11 = vmul.f32 -1.442695, %v426_v2 }
 0x659   :  { %v423_v5 = vpop.f32.mrf.mxu0 }
 0x65a   :  { %1072 = vpow2.f32 %v908_v11 }
 0x65b   :  { %v995_v7 = vpop.f32.mrf.mxu0 }
 0x665   :  { %v1071_v10 = vpop.eup %1070 }
 0x666   :  { %436 = vrot.lane.b32.xlu1 %v1071_v10, %s1212_s5 }
 0x667   :  { %v1073_v12 = vpop.eup %1072 }
 0x668   :  { %v430_v13 = vadd.f32 1.0, %v1073_v12  ;;  %v178_v12 = vadd.f32 %v1291_v9, %v1336_v62 }
 0x66a   :  { %1074 = vrcp.f32 %v430_v13 }
 0x677   :  { %v1075_v14 = vpop.eup %1074 }
 0x678   :  { %v434_v8 = vmul.f32 %v1075_v14, %v363_v51 }
 0x6d8   :  { %v437_v15 = vpop.permute.xlu1 %436 }
 0x6d9   :  { %v439_v16 = vmul.f32 %v1075_v14, %v437_v15 }
 0x6db   :  { %441 = vrot.lane.b32.xlu0 %v439_v16, %s1212_s5 }
 0x74d   :  { %v442_v17 = vpop.permute.xlu0 %441 }
 0x74e   :  { %v444_v18 = vadd.f32 %v442_v17, %v434_v8 }
 0x750   :  { %1076 = vtanh.f32 %v444_v18 }
 0x75d   :  { %v1077_v19 = vpop.eup %1076 }
 0x75e   :  { %447 = vrot.lane.b32.xlu1 %v1077_v19, %s1212_s5 }
 0x7d0   :  { %v448_v20 = vpop.permute.xlu1 %447 }
 0x7d1   :  { %v450_v21 = vmul.f32 %v1075_v14, %v448_v20 }
 0x7d3   :  { %v1343_v22 = vpack.c.bf16 %v450_v21, %v450_v21 }
 0x7d5   :  { %462 = vrot.lane.b32.xlu0 %v1343_v22, %s1206_s20 }
 0x847   :  { %v463_v23 = vpop.permute.xlu0 %462 }
 0x848   :  { %1001 = vmatmul.mubr.msk.bf16.vlgmr.msra.gmra.mxu1 %vm66_vm2, %v463_v23 }
 0x849   :  { %1013 = vmatpush3.bf16.msra.mxu1 %v1264_v3  ;;  %1016 = vmatprep.mubr.msk.bf16.mxu1 %vm1210_vm1, %v1209_v0 }
 0x84a   :  { %1014 = vmatprep.subr.bf16.mxu1 %v1209_v0 }
 0x84d   :  { %1015 = vmatpush3.bf16.msra.mxu1 %v1269_v6 }
 0x84e   :  { %1028 = vmatprep.subr.bf16.mxu1 %v1209_v0 }
 0x908   :  { %v501_v25 = vpop.f32.mrf.mxu1 }
 0x909   :  { %v507_v26 = vadd.f32 %v501_v25, %v170_v24 }
 0x90a   :  { %v1002_v27 = vpop.f32.mrf.mxu1 }
 0x90b   :  { %1078 = vtanh.f32 %v507_v26  ;;  %v911_v31 = vmul.f32 -1.442695, %v507_v26 }
 0x90c   :  { %v504_v28 = vpop.f32.mrf.mxu1 }
 0x90d   :  { %1080 = vpow2.f32 %v911_v31 }
 0x90e   :  { %v1003_v29 = vpop.f32.mrf.mxu1 }
 0x90f   :  { %v183_v29 = vadd.f32 %v1330_v59, %v1291_v9 }
 0x918   :  { %v1079_v30 = vpop.eup %1078 }
 0x919   :  { %517 = vrot.lane.b32.xlu1 %v1079_v30, %s1212_s5 }
 0x91a   :  { %v1081_v33 = vpop.eup %1080 }
 0x91b   :  { %v511_v35 = vadd.f32 1.0, %v1081_v33 }
 0x91d   :  { %1082 = vrcp.f32 %v511_v35 }
 0x92a   :  { %v1083_v36 = vpop.eup %1082 }
 0x92b   :  { %v515_v34 = vmul.f32 %v1083_v36, %v444_v18 }
 0x98b   :  { %v518_v37 = vpop.permute.xlu1 %517 }
 0x98c   :  { %v520_v38 = vmul.f32 %v1083_v36, %v518_v37 }
 0x98e   :  { %522 = vrot.lane.b32.xlu0 %v520_v38, %s1212_s5 }
 0xa00   :  { %v523_v39 = vpop.permute.xlu0 %522 }
 0xa01   :  { %v525_v40 = vadd.f32 %v523_v39, %v515_v34 }
 0xa03   :  { %1084 = vtanh.f32 %v525_v40 }
 0xa10   :  { %v1085_v41 = vpop.eup %1084 }
 0xa11   :  { %528 = vrot.lane.b32.xlu1 %v1085_v41, %s1212_s5 }
 0xa83   :  { %v529_v42 = vpop.permute.xlu1 %528 }
 0xa84   :  { %v531_v43 = vmul.f32 %v1083_v36, %v529_v42 }
 0xa86   :  { %v1359_v44 = vpack.c.bf16 %v531_v43, %v531_v43 }
 0xa88   :  { %543 = vrot.lane.b32.xlu0 %v1359_v44, %s1206_s20 }
 0xafa   :  { %v544_v45 = vpop.permute.xlu0 %543 }
 0xafb   :  { %1009 = vmatmul.mubr.msk.bf16.vlgmr.msra.gmra.mxu0 %vm66_vm2, %v544_v45 }
 0xafc   :  { %1021 = vmatpush3.bf16.msra.mxu0 %v1264_v3  ;;  %1024 = vmatprep.mubr.msk.bf16.mxu0 %vm1210_vm1, %v1209_v0 }
 0xafd   :  { %1022 = vmatprep.subr.bf16.mxu0 %v1209_v0 }
 0xb00   :  { %1023 = vmatpush3.bf16.msra.mxu0 %v1269_v6 }
 0xbbb   :  { %v582_v47 = vpop.f32.mrf.mxu0 }
 0xbbc   :  { %v588_v48 = vadd.f32 %v582_v47, %v175_v46 }
 0xbbd   :  { %v1010_v49 = vpop.f32.mrf.mxu0 }
 0xbbe   :  { %1086 = vtanh.f32 %v588_v48  ;;  %v914_v53 = vmul.f32 -1.442695, %v588_v48 }
 0xbbf   :  { %v585_v50 = vpop.f32.mrf.mxu0 }
 0xbc0   :  { %1088 = vpow2.f32 %v914_v53 }
 0xbc1   :  { %v1011_v51 = vpop.f32.mrf.mxu0 }
 0xbc2   :  { %v186_v51 = vadd.f32 %v1334_v61, %v1291_v9 }
 0xbcb   :  { %v1087_v52 = vpop.eup %1086 }
 0xbcc   :  { %598 = vrot.lane.b32.xlu1 %v1087_v52, %s1212_s5 }
 0xbcd   :  { %v1089_v54 = vpop.eup %1088 }
 0xbce   :  { %v592_v55 = vadd.f32 1.0, %v1089_v54 }
 0xbd0   :  { %1090 = vrcp.f32 %v592_v55 }
 0xbdd   :  { %v1091_v56 = vpop.eup %1090 }
 0xbde   :  { %v596_v60 = vmul.f32 %v1091_v56, %v525_v40 }
 0xc3e   :  { %v599_v58 = vpop.permute.xlu1 %598 }
 0xc3f   :  { %v601_v63 = vmul.f32 %v1091_v56, %v599_v58 }
 0xc41   :  { %603 = vrot.lane.b32.xlu0 %v601_v63, %s1212_s5 }
 0xcb3   :  { %v604_v1 = vpop.permute.xlu0 %603 }
 0xcb4   :  { %v606_v2 = vadd.f32 %v604_v1, %v596_v60 }
 0xcb6   :  { %1092 = vtanh.f32 %v606_v2 }
 0xcc3   :  { %v1093_v4 = vpop.eup %1092 }
 0xcc4   :  { %609 = vrot.lane.b32.xlu1 %v1093_v4, %s1212_s5 }
 0xd36   :  { %v610_v5 = vpop.permute.xlu1 %609 }
 0xd37   :  { %v612_v7 = vmul.f32 %v1091_v56, %v610_v5 }
 0xd39   :  { %v1374_v10 = vpack.c.bf16 %v612_v7, %v612_v7 }
 0xd3b   :  { %624 = vrot.lane.b32.xlu0 %v1374_v10, %s1206_s20 }
 0xdad   :  { %v625_v11 = vpop.permute.xlu0 %624 }
 0xdae   :  { %1017 = vmatmul.mubr.msk.bf16.vlgmr.msra.gmra.mxu1 %vm66_vm2, %v625_v11 }
 0xdaf   :  { %1029 = vmatpush3.bf16.msra.mxu1 %v1264_v3  ;;  %1032 = vmatprep.mubr.msk.bf16.mxu1 %vm1210_vm1, %v1209_v0 }
 0xdb0   :  { %1030 = vmatprep.subr.bf16.mxu1 %v1209_v0 }
 0xdb3   :  { %1031 = vmatpush3.bf16.msra.mxu1 %v1269_v6 }
 0xe6e   :  { %v663_v13 = vpop.f32.mrf.mxu1 }
 0xe6f   :  { %v669_v14 = vadd.f32 %v663_v13, %v178_v12 }
 0xe70   :  { %v1018_v15 = vpop.f32.mrf.mxu1 }
 0xe71   :  { %1094 = vtanh.f32 %v669_v14  ;;  %v917_v3 = vmul.f32 -1.442695, %v669_v14 }
 0xe72   :  { %v666_v16 = vpop.f32.mrf.mxu1 }
 0xe73   :  { %1096 = vpow2.f32 %v917_v3 }
 0xe74   :  { %v1019_v8 = vpop.f32.mrf.mxu1 }
 0xe7e   :  { %v1095_v17 = vpop.eup %1094 }
 0xe7f   :  { %679 = vrot.lane.b32.xlu1 %v1095_v17, %s1212_s5 }
 0xe80   :  { %v1097_v18 = vpop.eup %1096 }
 0xe81   :  { %v673_v19 = vadd.f32 1.0, %v1097_v18 }
 0xe83   :  { %1098 = vrcp.f32 %v673_v19 }
 0xe90   :  { %v1099_v0 = vpop.eup %1098 }
 0xe91   :  { %v677_v62 = vmul.f32 %v1099_v0, %v606_v2 }
 0xef1   :  { %v680_v20 = vpop.permute.xlu1 %679 }
 0xef2   :  { %v682_v6 = vmul.f32 %v1099_v0, %v680_v20 }
 0xef4   :  { %684 = vrot.lane.b32.xlu0 %v682_v6, %s1212_s5 }
 0xf66   :  { %v685_v21 = vpop.permute.xlu0 %684 }
 0xf67   :  { %v687_v23 = vadd.f32 %v685_v21, %v677_v62 }
 0xf69   :  { %1100 = vtanh.f32 %v687_v23 }
 0xf76   :  { %v1101_v24 = vpop.eup %1100 }
 0xf77   :  { %690 = vrot.lane.b32.xlu1 %v1101_v24, %s1212_s5 }
 0xfe9   :  { %v691_v25 = vpop.permute.xlu1 %690 }
 0xfea   :  { %v693_v26 = vmul.f32 %v1099_v0, %v691_v25 }
 0xfec   :  { %v1389_v27 = vpack.c.bf16 %v693_v26, %v693_v26 }
 0xfee   :  { %705 = vrot.lane.b32.xlu0 %v1389_v27, %s1206_s20 }
0x1060   :  { %v706_v28 = vpop.permute.xlu0 %705 }
0x1061   :  { %1025 = vmatmul.mubr.msk.bf16.vlgmr.msra.gmra.mxu0 %vm66_vm2, %v706_v28 }
0x1121   :  { %v744_v30 = vpop.f32.mrf.mxu0 }
0x1122   :  { %v750_v31 = vadd.f32 %v744_v30, %v183_v29 }
0x1123   :  { %v1026_v33 = vpop.f32.mrf.mxu0 }
0x1124   :  { %1102 = vtanh.f32 %v750_v31  ;;  %v920_v38 = vmul.f32 -1.442695, %v750_v31 }
0x1125   :  { %v747_v35 = vpop.f32.mrf.mxu0 }
0x1126   :  { %1104 = vpow2.f32 %v920_v38 }
0x1127   :  { %v1027_v36 = vpop.f32.mrf.mxu0 }
0x1131   :  { %v1103_v37 = vpop.eup %1102 }
0x1132   :  { %760 = vrot.lane.b32.xlu1 %v1103_v37, %s1212_s5 }
0x1133   :  { %v1105_v34 = vpop.eup %1104 }
0x1134   :  { %v754_v39 = vadd.f32 1.0, %v1105_v34 }
0x1136   :  { %1106 = vrcp.f32 %v754_v39 }
0x1143   :  { %v1107_v40 = vpop.eup %1106 }
0x1144   :  { %v758_v59 = vmul.f32 %v1107_v40, %v687_v23 }
0x11a4   :  { %v761_v41 = vpop.permute.xlu1 %760 }
0x11a5   :  { %v763_v42 = vmul.f32 %v1107_v40, %v761_v41 }
0x11a7   :  { %765 = vrot.lane.b32.xlu0 %v763_v42, %s1212_s5 }
0x1219   :  { %v766_v43 = vpop.permute.xlu0 %765 }
0x121a   :  { %v768_v45 = vadd.f32 %v766_v43, %v758_v59 }
0x121c   :  { %1108 = vtanh.f32 %v768_v45 }
0x1229   :  { %v1109_v46 = vpop.eup %1108 }
0x122a   :  { %771 = vrot.lane.b32.xlu1 %v1109_v46, %s1212_s5 }
0x129c   :  { %v772_v47 = vpop.permute.xlu1 %771 }
0x129d   :  { %v774_v48 = vmul.f32 %v1107_v40, %v772_v47 }
0x129f   :  { %v775_v49 = vpack.c.bf16 %v774_v48, %v774_v48 }
0x12a1   :  { %786 = vrot.lane.b32.xlu0 %v775_v49, %s1206_s20 }
0x1313   :  { %v787_v50 = vpop.permute.xlu0 %786 }
0x1314   :  { %1033 = vmatmul.mubr.msk.bf16.vlgmr.msra.gmra.mxu1 %vm66_vm2, %v787_v50 }
0x13d4   :  { %v825_v52 = vpop.f32.mrf.mxu1 }
0x13d5   :  { %v831_v53 = vadd.f32 %v825_v52, %v186_v51 }
0x13d6   :  { %v1034_v54 = vpop.f32.mrf.mxu1 }
0x13d7   :  { %1110 = vtanh.f32 %v831_v53  ;;  %v923_v63 = vmul.f32 -1.442695, %v831_v53 }
0x13d8   :  { %v828_v55 = vpop.f32.mrf.mxu1 }
0x13d9   :  { %1112 = vpow2.f32 %v923_v63 }
0x13da   :  { %v1035_v56 = vpop.f32.mrf.mxu1 }
0x13e4   :  { %v1111_v58 = vpop.eup %1110 }
0x13e5   :  { %841 = vrot.lane.b32.xlu1 %v1111_v58, %s1212_s5 }
0x13e6   :  { %v1113_v60 = vpop.eup %1112 }
0x13e7   :  { %v835_v1 = vadd.f32 1.0, %v1113_v60 }
0x13e9   :  { %1114 = vrcp.f32 %v835_v1 }
0x13f6   :  { %v1115_v2 = vpop.eup %1114 }
0x13f7   :  { %v839_v9 = vmul.f32 %v1115_v2, %v768_v45 }
0x1457   :  { %v842_v4 = vpop.permute.xlu1 %841 }
0x1458   :  { %v844_v5 = vmul.f32 %v1115_v2, %v842_v4 }
0x145a   :  { %846 = vrot.lane.b32.xlu0 %v844_v5, %s1212_s5 }
0x145e   :  { %293 = vrot.lane.b32.xlu0 %v1298_v32, %s1206_s20 }
0x1462   :  { %455 = vrot.lane.b32.xlu0 %v1343_v22, %s1206_s20 }
0x1466   :  { %617 = vrot.lane.b32.xlu0 %v1374_v10, %s1206_s20 }
0x146a   :  { %779 = vrot.lane.b32.xlu0 %v775_v49, %s1206_s20 }
0x14cc   :  { %v847_v61 = vpop.permute.xlu0 %846 }
0x14cd   :  { %v849_v7 = vadd.f32 %v847_v61, %v839_v9 }
0x14cf   :  { %1116 = vtanh.f32 %v849_v7  ;;  %867 = vrot.lane.b32.xlu0 %v849_v7, %s1213_s3 }
0x14d0   :  { %v294_v11 = vpop.permute.xlu0 %293 }
0x14d1   :  { %297 = vst.msk [vmem:[#allocation11] sm:$0xf] %vm64_vm0, %v294_v11 }
0x14d4   :  { %v456_v12 = vpop.permute.xlu0 %455 }
0x14d5   :  { %459 = vst.msk [vmem:[#allocation11 + $0x8] sm:$0xf] %vm64_vm0, %v456_v12 }
0x14d8   :  { %v618_v32 = vpop.permute.xlu0 %617 }
0x14d9   :  { %621 = vst.msk [vmem:[#allocation11 + $0x10] sm:$0xf] %vm64_vm0, %v618_v32 }
0x14dc   :  { %v1117_v22 = vpop.eup %1116  ;;  %v780_v13 = vpop.permute.xlu0 %779 }
0x14dd   :  { %783 = vst.msk [vmem:[#allocation11 + $0x18] sm:$0xf] %vm64_vm0, %v780_v13  ;;  %852 = vrot.lane.b32.xlu1 %v1117_v22, %s1212_s5 }
0x14e1   :  { %374 = vrot.lane.b32.xlu1 %v1319_v57, %s1206_s20 }
0x14e5   :  { %536 = vrot.lane.b32.xlu1 %v1359_v44, %s1206_s20 }
0x14e9   :  { %698 = vrot.lane.b32.xlu1 %v1389_v27, %s1206_s20 }
0x1541   :  { %v868_v10 = vpop.permute.xlu0 %867 }
0x1542   :  { %870 = vst.msk [vmem:[#allocation3] sm:$0xff] %vm66_vm2, %v868_v10 }
0x154f   :  { %v853_v14 = vpop.permute.xlu1 %852 }
0x1550   :  { %v855_v15 = vmul.f32 %v1115_v2, %v853_v14 }
0x1552   :  { %v932_v16 = vpack.c.bf16 %v855_v15, %v855_v15 }
0x1553   :  { %v375_v8 = vpop.permute.xlu1 %374 }
0x1554   :  { %378 = vst.msk [vmem:[#allocation11 + $0x4] sm:$0xf] %vm64_vm0, %v375_v8  ;;  %860 = vrot.lane.b32.xlu1 %v932_v16, %s1206_s20 }
0x1557   :  { %v537_v17 = vpop.permute.xlu1 %536 }
0x1558   :  { %540 = vst.msk [vmem:[#allocation11 + $0xc] sm:$0xf] %vm64_vm0, %v537_v17 }
0x155b   :  { %v699_v57 = vpop.permute.xlu1 %698 }
0x155c   :  { %702 = vst.msk [vmem:[#allocation11 + $0x14] sm:$0xf] %vm64_vm0, %v699_v57 }
0x15c6   :  { %v861_v44 = vpop.permute.xlu1 %860 }
0x15c7   :  { %864 = vst.msk [vmem:[#allocation11 + $0x1c] sm:$0xf] %vm64_vm0, %v861_v44  ;;  %865 = vst.msk [vmem:[#allocation2] sm:$0xf] %vm64_vm0, %v861_v44 }
0x15c8   :  { %1189 = shalt.err (!%p1186_p5)
}
0x15c9   :  { %882 = dma.vmem_to_hbm [thread:$0]  %s877_s7, 512, %s1440_s4, [#allocation7], %s1206_s20, %s1206_s20, %s1207_s21  }
0x15ca   :  { %1202 = dma.done.wait [#allocation7], 512  }
0x15cb   :  { %1203 = vsyncadd [#allocation7], 4294966784 }
0x15cc   :  { %886 = vsyncpa [#allocation6], 1 }
0x15cd   :  { %887 = vsyncpa [#allocation9], 1 }
0x15ce   :  { %888 = vsyncpa [#allocation7], 1 }

</bundles_post_ra>
